<compile_context>
chip_gen: v7x
topology: tpu7x:2x2x1
jax: 0.10.0
libtpu: 0.0.40
codegen_flags: <defaults>
</compile_context>

<pallas_src>
import jax
import jax.numpy as jnp
from jax import lax
from jax.experimental import pallas as pl
from jax.experimental.pallas import tpu as pltpu


def _make_conv_bn_relu_kernel(tap_offsets, c_in, lw, apply_relu):
    """tap_offsets: static flat offsets (kh * W_pad + kw), one per conv tap."""

    def kernel(x_ref, w_ref, shift_ref, o_ref, rhs_ref):
        # x_ref:     (C_in, L_total)       padded, flattened input (native dtype)
        # w_ref:     (C_out_t, T*C_in)     BN-folded weights for this C_out tile
        # shift_ref: (C_out_t, 1)          folded conv-bias / BN shift (f32)
        # o_ref:     (C_out_t, Lw)         "wide" output tile, Lw = H_out * W_pad
        # rhs_ref:   (T*C_in, Lw) scratch  stacked shifted slices (im2col-lite)
        for t, off in enumerate(tap_offsets):            # static, unrolled
            rhs_ref[t * c_in:(t + 1) * c_in, :] = x_ref[:, off:off + lw]
        acc = jnp.dot(w_ref[...], rhs_ref[...],
                      preferred_element_type=jnp.float32)   # one GEMM, K = T*C_in
        y = acc + shift_ref[...]
        if apply_relu:
            y = jnp.maximum(y, 0.0)
        o_ref[...] = y.astype(o_ref.dtype)

    return kernel


def _pick_cout_tile(c_out, target=128):
    """Largest divisor of c_out <= target that keeps blocks layout-friendly."""
    if c_out <= target:
        return c_out
    for d in range(target, 0, -1):
        if c_out % d == 0 and d % 8 == 0:
            return d
    return c_out


def basic_conv(x, conv_weight, conv_bias=None, bn_params=None, *,
               stride=1, padding=0, dilation=1, groups=1, relu=True,
               compute_dtype=jnp.bfloat16, return_wide=False):
    """Fused Conv2d + eval-mode BatchNorm2d + ReLU for NCHW inputs."""
    if stride != 1 or dilation != 1 or groups != 1:
        raise NotImplementedError("only stride=1, dilation=1, groups=1 supported")

    N, C_in, H, W = x.shape
    C_out, C_in_w, KH, KW = conv_weight.shape
    assert C_in_w == C_in, "groups != 1 not supported"
    if compute_dtype is None:
        compute_dtype = x.dtype
    compute_dtype = jnp.dtype(compute_dtype)
    out_dtype = x.dtype

    p = padding
    H_pad, W_pad = H + 2 * p, W + 2 * p
    H_out, W_out = H_pad - KH + 1, W_pad - KW + 1
    assert H_out > 0 and W_out > 0
    T = KH * KW
    Lw = H_out * W_pad                                  # lane-dense wide length

    # Zero-pad spatially (+ one slack row so every shifted flat slice stays in
    # bounds) and flatten the spatial dims — contiguous merge => free reshape.
    x_c = x.astype(compute_dtype)
    x_p = jnp.pad(x_c, ((0, 0), (0, 0), (p, p + 1), (p, p)))
    L_total = (H_pad + 1) * W_pad
    x_flat = x_p.reshape(N, C_in, L_total)

    # Fold conv bias + eval-mode BN:  y = conv(x, W * scale) + shift.
    bias = (jnp.zeros((C_out,), jnp.float32) if conv_bias is None
            else conv_bias.astype(jnp.float32))
    if bn_params is not None:
        gamma, beta, running_mean, running_var, eps = bn_params
        scale = gamma.astype(jnp.float32) * lax.rsqrt(
            running_var.astype(jnp.float32) + eps)
        shift = (bias - running_mean.astype(jnp.float32)) * scale + beta.astype(jnp.float32)
    else:
        scale = jnp.ones((C_out,), jnp.float32)
        shift = bias
    w_folded = conv_weight.astype(jnp.float32) * scale[:, None, None, None]
    # (C_out, C_in, KH, KW) -> (C_out, KH*KW*C_in); flat col = t*C_in + c with
    # t = kh*KW + kw — must match the row order of the stacked rhs in the kernel.
    w2 = jnp.transpose(w_folded, (0, 2, 3, 1)).reshape(C_out, T * C_in)
    w2 = w2.astype(compute_dtype)
    shift2d = shift.reshape(C_out, 1)

    tap_offsets = tuple(kh * W_pad + kw for kh in range(KH) for kw in range(KW))
    c_tile = _pick_cout_tile(C_out)
    n_ctiles = C_out // c_tile

    kernel = _make_conv_bn_relu_kernel(tap_offsets, C_in, Lw, relu)

    # ---- VMEM budget: double-buffered pipeline blocks + scratch + temporaries.
    ci = compute_dtype.itemsize
    oi = jnp.dtype(out_dtype).itemsize
    x_blk = C_in * L_total * ci
    w_blk = c_tile * T * C_in * ci
    s_blk = c_tile * 4
    o_blk = c_tile * Lw * oi
    rhs_scratch = T * C_in * Lw * ci
    acc_tmp = 2 * c_tile * Lw * 4
    vmem_needed = 2 * (x_blk + w_blk + s_blk + o_blk) + rhs_scratch + acc_tmp + (1 << 20)
    try:
        vmem_cap = int(pltpu.get_tpu_info().vmem_capacity_bytes)
    except Exception:
        vmem_cap = 64 * 1024 * 1024
    vmem_limit = int(min(int(vmem_cap * 0.85),
                         max(vmem_needed, 32 * 1024 * 1024)))

    flops = 2 * N * C_out * T * C_in * Lw
    bytes_accessed = (x_flat.size * ci + N * C_out * Lw * oi
                      + w2.size * ci + C_out * 4)

    out_wide = pl.pallas_call(
        kernel,
        out_shape=jax.ShapeDtypeStruct((N, C_out, Lw), out_dtype),
        grid_spec=pltpu.PrefetchScalarGridSpec(
            num_scalar_prefetch=0,
            grid=(N, n_ctiles),
            in_specs=[
                pl.BlockSpec((None, C_in, L_total), lambda n, c: (n, 0, 0)),
                pl.BlockSpec((c_tile, T * C_in), lambda n, c: (c, 0)),
                pl.BlockSpec((c_tile, 1), lambda n, c: (c, 0)),
            ],
            out_specs=pl.BlockSpec((None, c_tile, Lw), lambda n, c: (n, c, 0)),
            scratch_shapes=[pltpu.VMEM((T * C_in, Lw), compute_dtype)],
        ),
        compiler_params=pltpu.CompilerParams(
            dimension_semantics=("parallel", "parallel"),
            vmem_limit_bytes=vmem_limit,
        ),
        cost_estimate=pl.CostEstimate(
            flops=flops, transcendentals=0, bytes_accessed=bytes_accessed),
    )(x_flat, w2, shift2d)

    if return_wide:
        # Interchange format for chaining BasicConv layers (garbage in the last
        # W_pad - W_out columns) — avoids the extra full-output slice round trip.
        return out_wide.reshape(N, C_out, H_out, W_pad)

    # (N, C_out, H_out*W_pad) -> (N, C_out, H_out, W_pad) is a free split-reshape;
    # then drop the W_pad - W_out slack columns to match the module's output.
    return out_wide.reshape(N, C_out, H_out, W_pad)[:, :, :, :W_out]


def basic_conv_reference(x, conv_weight, conv_bias=None, bn_params=None, *,
                         stride=1, padding=0, dilation=1, groups=1, relu=True):
    out = lax.conv_general_dilated(
        x, conv_weight,
        window_strides=(stride, stride),
        padding=((padding, padding), (padding, padding)),
        lhs_dilation=(1, 1), rhs_dilation=(dilation, dilation),
        dimension_numbers=("NCHW", "OIHW", "NCHW"),
        feature_group_count=groups,
        precision=lax.Precision.HIGHEST)
    if conv_bias is not None:
        out = out + conv_bias[None, :, None, None]
    if bn_params is not None:
        gamma, beta, mean, var, eps = bn_params
        out = (gamma[None, :, None, None] * (out - mean[None, :, None, None])
               * lax.rsqrt(var[None, :, None, None] + eps) + beta[None, :, None, None])
    if relu:
        out = jnp.maximum(out, 0.0)
    return out.astype(x.dtype)


if __name__ == "__main__":
    # BasicConv(in_planes=4, out_planes=8, kernel_size=3, padding=1, bn=True, relu=True)
    N, C_in, H, W = 2, 4, 16, 16
    C_out, K, pad = 8, 3, 1
    eps = 1e-5

    key = jax.random.PRNGKey(0)
    k1, k2, k3, k4, k5, k6 = jax.random.split(key, 6)
    x = jax.random.normal(k1, (N, C_in, H, W), dtype=jnp.float32)
    conv_w = jax.random.normal(k2, (C_out, C_in, K, K), dtype=jnp.float32) * 0.1
    gamma = 1.0 + 0.1 * jax.random.normal(k3, (C_out,), dtype=jnp.float32)
    beta = 0.1 * jax.random.normal(k4, (C_out,), dtype=jnp.float32)
    running_mean = 0.1 * jax.random.normal(k5, (C_out,), dtype=jnp.float32)
    running_var = jax.nn.softplus(jax.random.normal(k6, (C_out,), dtype=jnp.float32)) + 0.5
    bn = (gamma, beta, running_mean, running_var, eps)

    ref = basic_conv_reference(x, conv_w, conv_bias=None, bn_params=bn,
                               padding=pad, relu=True)

    # f32 operands: tight check against the XLA reference.
    out_f32 = basic_conv(x, conv_w, conv_bias=None, bn_params=bn, padding=pad,
                         relu=True, compute_dtype=jnp.float32)
    out_f32 = jax.block_until_ready(out_f32)
    assert out_f32.shape == (N, C_out, H, W), out_f32.shape
    assert jnp.allclose(out_f32, ref, atol=5e-3, rtol=5e-3), \
        float(jnp.max(jnp.abs(out_f32 - ref)))

    # bf16 MXU path (default): looser tolerance for bf16 operand rounding.
    out_bf16 = basic_conv(x, conv_w, conv_bias=None, bn_params=bn, padding=pad,
                          relu=True, compute_dtype=jnp.bfloat16)
    out_bf16 = jax.block_until_ready(out_bf16)
    assert out_bf16.shape == (N, C_out, H, W), out_bf16.shape
    assert jnp.allclose(out_bf16, ref, atol=6e-2, rtol=6e-2), \
        float(jnp.max(jnp.abs(out_bf16 - ref)))

    print("KERNEL_OK")
</pallas_src>

<mosaic_0001>
module attributes {stable_mosaic.version = 11 : i64} {
  func.func @kernel(%arg0: i32, %arg1: i32, %arg2: memref<1x4x342xf32, #tpu.memory_space<vmem>>, %arg3: memref<8x36xf32, #tpu.memory_space<vmem>>, %arg4: memref<8x1xf32, #tpu.memory_space<vmem>>, %arg5: memref<1x8x288xf32, #tpu.memory_space<vmem>>, %arg6: memref<36x288xf32, #tpu.memory_space<vmem>>) attributes {dimension_semantics = [#tpu.dimension_semantics<parallel>, #tpu.dimension_semantics<parallel>], iteration_bounds = array<i64: 2, 1>, scalar_prefetch = 0 : i64, scratch_operands = 1 : i64, tpu.core_type = #tpu.core_type<tc>, window_params = [{transform_indices = @transform_0, window_bounds = array<i64: 1, 4, 342>}, {transform_indices = @transform_1, window_bounds = array<i64: 8, 36>}, {transform_indices = @transform_2, window_bounds = array<i64: 8, 1>}, {transform_indices = @transform_3, window_bounds = array<i64: 1, 8, 288>}]} {
    %c0 = arith.constant 0 : index
    %c0_0 = arith.constant 0 : index
    %c0_1 = arith.constant 0 : index
    %0 = vector.load %arg2[%c0, %c0_0, %c0_1] : memref<1x4x342xf32, #tpu.memory_space<vmem>>, vector<1x4x288xf32>
    %1 = vector.shape_cast %0 : vector<1x4x288xf32> to vector<4x288xf32>
    %c0_2 = arith.constant 0 : index
    %c0_3 = arith.constant 0 : index
    %2 = vector.load %arg6[%c0_2, %c0_3] : memref<36x288xf32, #tpu.memory_space<vmem>>, vector<4x288xf32>
    tpu.vector_store %arg6[%c0_2, %c0_3], %1 {strides = array<i32>} : memref<36x288xf32, #tpu.memory_space<vmem>>, vector<4x288xf32>,
    %c0_4 = arith.constant 0 : index
    %c0_5 = arith.constant 0 : index
    %c1 = arith.constant 1 : index
    %3 = vector.load %arg2[%c0_4, %c0_5, %c1] : memref<1x4x342xf32, #tpu.memory_space<vmem>>, vector<1x4x288xf32>
    %4 = vector.shape_cast %3 : vector<1x4x288xf32> to vector<4x288xf32>
    %c4 = arith.constant 4 : index
    %c0_6 = arith.constant 0 : index
    %5 = vector.load %arg6[%c4, %c0_6] : memref<36x288xf32, #tpu.memory_space<vmem>>, vector<4x288xf32>
    tpu.vector_store %arg6[%c4, %c0_6], %4 {strides = array<i32>} : memref<36x288xf32, #tpu.memory_space<vmem>>, vector<4x288xf32>,
    %c0_7 = arith.constant 0 : index
    %c0_8 = arith.constant 0 : index
    %c2 = arith.constant 2 : index
    %6 = vector.load %arg2[%c0_7, %c0_8, %c2] : memref<1x4x342xf32, #tpu.memory_space<vmem>>, vector<1x4x288xf32>
    %7 = vector.shape_cast %6 : vector<1x4x288xf32> to vector<4x288xf32>
    %c8 = arith.constant 8 : index
    %c0_9 = arith.constant 0 : index
    %8 = vector.load %arg6[%c8, %c0_9] : memref<36x288xf32, #tpu.memory_space<vmem>>, vector<4x288xf32>
    tpu.vector_store %arg6[%c8, %c0_9], %7 {strides = array<i32>} : memref<36x288xf32, #tpu.memory_space<vmem>>, vector<4x288xf32>,
    %c0_10 = arith.constant 0 : index
    %c0_11 = arith.constant 0 : index
    %c18 = arith.constant 18 : index
    %9 = vector.load %arg2[%c0_10, %c0_11, %c18] : memref<1x4x342xf32, #tpu.memory_space<vmem>>, vector<1x4x288xf32>
    %10 = vector.shape_cast %9 : vector<1x4x288xf32> to vector<4x288xf32>
    %c12 = arith.constant 12 : index
    %c0_12 = arith.constant 0 : index
    %11 = vector.load %arg6[%c12, %c0_12] : memref<36x288xf32, #tpu.memory_space<vmem>>, vector<4x288xf32>
    tpu.vector_store %arg6[%c12, %c0_12], %10 {strides = array<i32>} : memref<36x288xf32, #tpu.memory_space<vmem>>, vector<4x288xf32>,
    %c0_13 = arith.constant 0 : index
    %c0_14 = arith.constant 0 : index
    %c19 = arith.constant 19 : index
    %12 = vector.load %arg2[%c0_13, %c0_14, %c19] : memref<1x4x342xf32, #tpu.memory_space<vmem>>, vector<1x4x288xf32>
    %13 = vector.shape_cast %12 : vector<1x4x288xf32> to vector<4x288xf32>
    %c16 = arith.constant 16 : index
    %c0_15 = arith.constant 0 : index
    %14 = vector.load %arg6[%c16, %c0_15] : memref<36x288xf32, #tpu.memory_space<vmem>>, vector<4x288xf32>
    tpu.vector_store %arg6[%c16, %c0_15], %13 {strides = array<i32>} : memref<36x288xf32, #tpu.memory_space<vmem>>, vector<4x288xf32>,
    %c0_16 = arith.constant 0 : index
    %c0_17 = arith.constant 0 : index
    %c20 = arith.constant 20 : index
    %15 = vector.load %arg2[%c0_16, %c0_17, %c20] : memref<1x4x342xf32, #tpu.memory_space<vmem>>, vector<1x4x288xf32>
    %16 = vector.shape_cast %15 : vector<1x4x288xf32> to vector<4x288xf32>
    %c20_18 = arith.constant 20 : index
    %c0_19 = arith.constant 0 : index
    %17 = vector.load %arg6[%c20_18, %c0_19] : memref<36x288xf32, #tpu.memory_space<vmem>>, vector<4x288xf32>
    tpu.vector_store %arg6[%c20_18, %c0_19], %16 {strides = array<i32>} : memref<36x288xf32, #tpu.memory_space<vmem>>, vector<4x288xf32>,
    %c0_20 = arith.constant 0 : index
    %c0_21 = arith.constant 0 : index
    %c36 = arith.constant 36 : index
    %18 = vector.load %arg2[%c0_20, %c0_21, %c36] : memref<1x4x342xf32, #tpu.memory_space<vmem>>, vector<1x4x288xf32>
    %19 = vector.shape_cast %18 : vector<1x4x288xf32> to vector<4x288xf32>
    %c24 = arith.constant 24 : index
    %c0_22 = arith.constant 0 : index
    %20 = vector.load %arg6[%c24, %c0_22] : memref<36x288xf32, #tpu.memory_space<vmem>>, vector<4x288xf32>
    tpu.vector_store %arg6[%c24, %c0_22], %19 {strides = array<i32>} : memref<36x288xf32, #tpu.memory_space<vmem>>, vector<4x288xf32>,
    %c0_23 = arith.constant 0 : index
    %c0_24 = arith.constant 0 : index
    %c37 = arith.constant 37 : index
    %21 = vector.load %arg2[%c0_23, %c0_24, %c37] : memref<1x4x342xf32, #tpu.memory_space<vmem>>, vector<1x4x288xf32>
    %22 = vector.shape_cast %21 : vector<1x4x288xf32> to vector<4x288xf32>
    %c28 = arith.constant 28 : index
    %c0_25 = arith.constant 0 : index
    %23 = vector.load %arg6[%c28, %c0_25] : memref<36x288xf32, #tpu.memory_space<vmem>>, vector<4x288xf32>
    tpu.vector_store %arg6[%c28, %c0_25], %22 {strides = array<i32>} : memref<36x288xf32, #tpu.memory_space<vmem>>, vector<4x288xf32>,
    %c0_26 = arith.constant 0 : index
    %c0_27 = arith.constant 0 : index
    %c38 = arith.constant 38 : index
    %24 = vector.load %arg2[%c0_26, %c0_27, %c38] : memref<1x4x342xf32, #tpu.memory_space<vmem>>, vector<1x4x288xf32>
    %25 = vector.shape_cast %24 : vector<1x4x288xf32> to vector<4x288xf32>
    %c32 = arith.constant 32 : index
    %c0_28 = arith.constant 0 : index
    %26 = vector.load %arg6[%c32, %c0_28] : memref<36x288xf32, #tpu.memory_space<vmem>>, vector<4x288xf32>
    tpu.vector_store %arg6[%c32, %c0_28], %25 {strides = array<i32>} : memref<36x288xf32, #tpu.memory_space<vmem>>, vector<4x288xf32>,
    %c0_29 = arith.constant 0 : index
    %c0_30 = arith.constant 0 : index
    %27 = vector.load %arg3[%c0_29, %c0_30] : memref<8x36xf32, #tpu.memory_space<vmem>>, vector<8x36xf32>
    %c0_31 = arith.constant 0 : index
    %c0_32 = arith.constant 0 : index
    %28 = vector.load %arg6[%c0_31, %c0_32] : memref<36x288xf32, #tpu.memory_space<vmem>>, vector<36x288xf32>
    %cst = arith.constant dense<0.000000e+00> : vector<8x288xf32>
    %29 = tpu.matmul %27, %28, %cst {dimension_numbers = #tpu.dot_dimension_numbers<[1], [0], [0], [1], [0, 0, 1, 1], [], []>} : vector<8x36xf32>, vector<36x288xf32>, vector<8x288xf32> -> vector<8x288xf32>
    %c0_33 = arith.constant 0 : index
    %c0_34 = arith.constant 0 : index
    %30 = vector.load %arg4[%c0_33, %c0_34] : memref<8x1xf32, #tpu.memory_space<vmem>>, vector<8x1xf32>
    %31 = vector.broadcast %30 : vector<8x1xf32> to vector<8x288xf32>
    %32 = arith.addf %29, %31 : vector<8x288xf32>
    %cst_35 = arith.constant 0.000000e+00 : f32
    %33 = vector.broadcast %cst_35 : f32 to vector<8x288xf32>
    %34 = arith.maximumf %32, %33 : vector<8x288xf32>
    %c0_36 = arith.constant 0 : index
    %c0_37 = arith.constant 0 : index
    %c0_38 = arith.constant 0 : index
    %35 = vector.load %arg5[%c0_36, %c0_37, %c0_38] : memref<1x8x288xf32, #tpu.memory_space<vmem>>, vector<1x8x288xf32>
    %36 = vector.shape_cast %35 : vector<1x8x288xf32> to vector<8x288xf32>
    %37 = vector.shape_cast %34 : vector<8x288xf32> to vector<1x8x288xf32>
    tpu.vector_store %arg5[%c0_36, %c0_37, %c0_38], %37 {strides = array<i32>} : memref<1x8x288xf32, #tpu.memory_space<vmem>>, vector<1x8x288xf32>,
    return
  }
  func.func @transform_0(%arg0: i32, %arg1: i32) -> (i32, i32, i32) {
    %c0_i32 = arith.constant 0 : i32
    %c0_i32_0 = arith.constant 0 : i32
    %c0_i32_1 = arith.constant 0 : i32
    return %arg0, %c0_i32, %c0_i32_0 : i32, i32, i32
  }
  func.func @transform_1(%arg0: i32, %arg1: i32) -> (i32, i32) {
    %c0_i32 = arith.constant 0 : i32
    %c0_i32_0 = arith.constant 0 : i32
    return %arg1, %c0_i32 : i32, i32
  }
  func.func @transform_2(%arg0: i32, %arg1: i32) -> (i32, i32) {
    %c0_i32 = arith.constant 0 : i32
    %c0_i32_0 = arith.constant 0 : i32
    return %arg1, %c0_i32 : i32, i32
  }
  func.func @transform_3(%arg0: i32, %arg1: i32) -> (i32, i32, i32) {
    %c0_i32 = arith.constant 0 : i32
    %c0_i32_0 = arith.constant 0 : i32
    return %arg0, %arg1, %c0_i32 : i32, i32, i32
  }
}

</mosaic_0001>

<bundles_post_ra>
// kernel: tpu_custom_call.1
= control target key start
LH: loop header
LB: loop body
LE: loop exit
PB: predicated region body
PF: predicated region fallthrough
CT: control target
= control target key end

     0   :  { %8 = vsyncpa [#allocation4], 0  ;;  %s1219_s0 = inlined_call_operand.hbm [shape: f32[2,4,342], index: 0, kind: input, shape index: {}]   ;;  %s1220_s1 = inlined_call_operand.vmem [shape: f32[8,36], index: 1, kind: input, shape index: {}]   ;;  %s1221_s2 = inlined_call_operand.vmem [shape: f32[8,1], index: 2, kind: input, shape index: {}]   ;;  %s1222_s3 = inlined_call_operand.hbm [shape: f32[2,8,288], index: 3, kind: output, shape index: {}]  }
   0x1   :  { %10 = vsyncpa [#allocation4 + $0x1], 0 }
   0x2   :  { %11 = vsyncpa [#allocation5], 0 }
   0x3   :  { %13 = vsyncpa [#allocation5 + $0x1], 0  ;;  %s1004_s12 = smov 0   ;;  %s1006_s13 = smov 0  }
   0x4   :  { %s1008_s14 = smov 0   ;;  %s1010_s15 = smov 0  }
   0x5   :  { %s1012_s16 = smov 0   ;;  %s1014_s17 = smov 0  }
   0x6 LB: > { %s721_s18 = sadd.s32 4294967295, %s968_s17   ;;  %s722_s19 = sadd.s32 4294967294, %s968_s17   ;;  %s968_s17 = sphi %s1014_s17, %s19_s17   ;;  %s964_s16 = sphi %s1012_s16, %s1237_s16   ;;  %s960_s15 = sphi %s1010_s15, %s1236_s15   ;;  %s956_s14 = sphi %s1008_s14, %s1235_s14   ;;  %s952_s13 = sphi %s1006_s13, %s1234_s13   ;;  %s948_s12 = sphi %s1004_s12, %s1233_s12  }
   0x7   : > { %s31_s20 = sadd.s32 1, %s964_s16  ;;  %s38_s21 = sadd.s32 1, %s956_s14 }
   0x8   : > { %p33_p0 = scmp.ge.s32.totalorder %s31_s20, 2  ;;  %p45_p1 = scmp.ne.s32.totalorder %s956_s14, %s952_s13 }
   0x9   : > { %p46_p2 = scmp.eq.s32.totalorder %s968_s17, 0  ;;  %p51_p3 = scmp.ne.s32.totalorder %s952_s13, %s948_s12 }
   0xa   : > { %s1239_s20 = smov (%p33_p0, %s31_s20), 0  ;;  %p52_p5 = scmp.eq.s32.totalorder %s721_s18, 0 }
   0xb   : > { %p1045_p4 = por %p46_p2, %p45_p1  ;;  %s35_s23 = ssub.s32 %s964_s16, %s1239_s20 }
   0xc   : > { %p129_p6 = scmp.eq.s32.totalorder %s721_s18, 1  ;;  %p36_p7 = scmp.eq.s32.totalorder %s35_s23, 0 }
   0xd   : > { %p1051_p8 = por %p52_p5, %p51_p3  ;;  %p135_p10 = scmp.eq.s32.totalorder %s722_s19, 1 }
   0xe   : > { %p1055_p9 = por %p129_p6, %p45_p1  ;;  %p787_p13 = scmp.lt.s32.totalorder %s968_s17, 2 }
   0xf   : > { %s1060_s26 = scalar_select %p36_p7, %s956_s14, %s38_s21  }
  0x10   : > { %s1226_s25 = scalar_select %p1055_p9, 1, 0 }
  0x11   : > { %p1062_p11 = por %p135_p10, %p51_p3  ;;  %s169_s28 = sand.u32 1, %s956_s14  }
  0x12   : > { %s770_s29 = smul.u32 12, %s169_s28  ;;  %p1072_p0 = pnand %p787_p13, %p1045_p4 }
  0x13   : > { %s1227_s27 = scalar_select %p1062_p11, 1, 0 }
  0x14   : > { %s771_s30 = smul.u32 192, %s964_s16  ;;  %s173_s8 = scalar_lea.vmem [#allocation3], %s770_s29 }
  0x15   : > { %s181_s9 = sshll.u32 %s173_s8, 4  ;;  %s170_s10 = scalar_lea.sflag [#allocation4], %s169_s28  ;;  %s1082_s9 = int_to_ptr.vmem [resolvable:$true] %s181_s9 }
  0x16   : > { %s1080_s7 = scalar_lea.hbm %s1219_s0, %s771_s30  ;;  %p858_p3 = pneg %p1072_p0 }
  0x17   : > { %s856_s11 = scalar_lea.hbm %s1080_s7, 192  ;;  %s861_s21 = scalar_lea.hbm %s1219_s0, 384 }
  0x18   : > { %p857_p2 = scmp.ne.s32.totalorder %s1080_s7, %s856_s11  ;;  %p862_p6 = scmp.lt.u32.totalorder %s1080_s7, %s1219_s0 }
  0x19   : > { %p863_p7 = scmp.lt.u32.totalorder %s861_s21, %s856_s11  ;;  %p865_p13 = scmp.lt.u32.totalorder %s856_s11, %s1080_s7 }
  0x1a   : > { %p859_p4 = pnand %p858_p3, %p857_p2 }
  0x1b   : > { %p864_p10 = por %p863_p7, %p862_p6 }
  0x1c   : > { %p860_p5 = pneg %p859_p4 }
  0x1d   : > { %p866_p12 = por %p865_p13, %p864_p10 }
  0x1f   : > { %p867_p1 = pnand %p866_p12, %p860_p5 }
  0x21   : > { %870 = shalt.err (!%p867_p1)
}
  0x22   : > { %s871_s28 = scalar_lea.vmem %s1082_s9, 192  ;;  %s970_s29 = smov [#allocation3]  }
  0x23   : > { %p872_p2 = scmp.ne.s32.totalorder %s1082_s9, %s871_s28  ;;  %s876_s30 = sshll.u32 %s970_s29, 4  ;;  %s877_s30 = int_to_ptr.vmem [resolvable:$false] %s876_s30 }
  0x24   : > { %s878_s5 = scalar_lea.vmem %s877_s30, 384  ;;  %p879_p9 = scmp.lt.s32.totalorder %s1082_s9, %s877_s30 }
  0x25   : > { %p874_p4 = pnand %p872_p2, %p858_p3  ;;  %p880_p6 = scmp.lt.s32.totalorder %s878_s5, %s871_s28 }
  0x27   : > { %p875_p11 = pneg %p874_p4  ;;  %p881_p7 = por %p880_p6, %p879_p9 }
  0x29   : > { %p882_p10 = pnand %p881_p7, %p875_p11 }
  0x2b   : > { %885 = shalt.err (!%p882_p10)
}
  0x2c   : > { %782 = dma.hbm_to_vmem [thread:$0]  (!%p1072_p0), %s1080_s7, 192, %s1082_s9, %s170_s10  }
  0x2d   : > { %p186_p12 = scmp.lt.s32.totalorder %s968_s17, 3  ;;  %p1229_p1 = scmp.ge.s32.totalorder %s968_s17, 1 }
  0x2f   : > { %p187_p3 = pnand %p1229_p1, %p186_p12 }
  0x30   : > { %s1113_s6 = sand.u32 (!%p187_p3), 1, %s952_s13  }
  0x31   : > { %190 = sbr.rel (%p187_p3) target bundleno = 460 (0x1cc), region = 32  ;;  %s193_s11 = scalar_lea.sflag (!%p187_p3), [#allocation4], %s1113_s6 }
  0x32   : > { %s772_s8 = smul.u32 (!%p187_p3), 12, %s1113_s6 }
  0x34   : > { %s1117_s18 = scalar_lea.vmem (!%p187_p3), [#allocation3], %s772_s8 }
  0x38   : > { %939 = dma.done.wait (%p1051_p8), %s193_s11, 192  }
  0x39   : > { %941 = vsyncadd (%p1051_p8), %s193_s11, 4294967104  ;;  %v267_v0 = vld [vmem:[%s1117_s18 + $0x8] sm:$0xf]  ;;  %v244_v1 = vld [vmem:[%s1117_s18] sm:$0xff]  ;;  %s971_s4 = smov 126   ;;  %s972_s7 = smov 127  }
  0x3a   : > { %275 = vrot.lane.b32.xlu1 %v267_v0, %s971_s4  ;;  %252 = vrot.lane.b32.xlu0 %v244_v1, %s972_s7  ;;  %v270_v2 = vcombine.high %v244_v1, %v244_v1  ;;  %240 = vst [vmem:[#allocation2] sm:$0xf] %v244_v1  ;;  %vm242_vm0 = vcmask 257024   ;;  %v236_v3 = vld [vmem:[%s1117_s18 + $0x8] sm:$0xf]  ;;  %s973_s24 = smov 110   ;;  %v248_v7 = vcombine.low %v244_v1, %v244_v1 }
  0x3b   : > { %v852_v4 = vld [vmem:[%s1117_s18 + $0x8] ss:$0 sps:$4 sm:$0xff]   ;;  %243 = vst.msk [vmem:[#allocation2 + $0x10] sm:$0xf] %vm242_vm0, %v236_v3  ;;  %v974_v6 = vmov 0.0|0.0   ;;  %s975_s9 = smov 109  }
  0x3c   : > { %241 = vst [vmem:[#allocation2 + $0x8] sm:$0xf] %v270_v2  ;;  %v853_v5 = vld [vmem:[%s1117_s18 + $0x8] ss:$0 sps:$4 sm:$0xff]   ;;  %764 = vmatprep.subr.bf16.mxu1 %v974_v6  ;;  %s976_s10 = smov 108   ;;  %s977_s19 = smov 92  }
  0x3d   : > { %v308_v8 = vld [vmem:[%s1117_s18 + $0x8] sm:$0xf]  ;;  %s978_s21 = smov 91   ;;  %v979_v12 = vmov 0.0   ;;  %s980_s22 = smov 90   ;;  %vm981_vm1 = vmmov 0  }
  0x3e   : > { %273 = vrot.lane.b32.xlu1 %v270_v2, %s971_s4  ;;  %294 = vrot.lane.b32.xlu0 %v244_v1, %s973_s24  ;;  %v854_v9 = vld [vmem:[%s1117_s18 + $0x8] ss:$0 sps:$4 sm:$0xff]   ;;  %v982_v14 = vmov 0   ;;  %vm277_vm2 = vcmask 1031168   ;;  %vm264_vm3 = vcmask 261124   ;;  %vm298_vm4 = vcmask 900096  }
  0x3f   : > { %v349_v10 = vld [vmem:[%s1117_s18 + $0x8] sm:$0xf]  ;;  %509 = vmatprep.mubr.f32.mxu0 %v979_v12  ;;  %753 = vmatprep.mubr.msk.f32.mxu1 %vm981_vm1, %v979_v12  ;;  %vm256_vm5 = vcmask 1039360   ;;  %vm318_vm6 = vcmask 891904   ;;  %vm339_vm7 = vcmask 883712   ;;  %vm359_vm8 = vcmask 752640  }
  0x40   : > { %v855_v11 = vld [vmem:[%s1117_s18 + $0x8] ss:$0 sps:$4 sm:$0xff]   ;;  %849 = vset.pattern.permute.xlu0 %v982_v14  ;;  %vm380_vm9 = vcmask 744448   ;;  %vm400_vm10 = vcmask 736256   ;;  %vm435_vm11 = vcmask 1043456   ;;  %vm431_vm12 = vcmask 293888  }
  0x41   : > { %v390_v13 = vld [vmem:[%s1117_s18 + $0x8] sm:$0xf]  ;;  %s773_s5 = smul.u32 24, %s1113_s6  ;;  %vm591_vm13 = vcmask 261120   ;;  %p1230_p9 = scmp.ne.s32.totalorder %s1226_s25, 0 }
  0x42   : > { %296 = vrot.lane.b32.xlu1 %v852_v4, %s973_s24  ;;  %254 = vrot.lane.b32.xlu0 %v853_v5, %s972_s7  ;;  %v425_v15 = vld [vmem:[%s1221_s2] sm:$0xff]  ;;  %s774_s8 = smul.u32 384, %s960_s15  ;;  %s594_s15 = scalar_lea.sflag [#allocation5], %s1113_s6 }
  0x43   : > { %s226_s11 = scalar_lea.vmem [#allocation6], %s773_s5 }
  0x44   : > { %s610_s18 = sshll.u32 %s226_s11, 4  ;;  %s1172_s18 = int_to_ptr.vmem [resolvable:$true] %s610_s18 }
  0x46   : > { %271 = vrot.lane.b32.xlu1 %v244_v1, %s971_s4  ;;  %250 = vrot.lane.b32.xlu0 %v248_v7, %s972_s7 }
  0x4a   : > { %314 = vrot.lane.b32.xlu1 %v270_v2, %s975_s9  ;;  %292 = vrot.lane.b32.xlu0 %v248_v7, %s973_s24  ;;  %s1170_s24 = scalar_lea.hbm %s1222_s3, %s774_s8 }
  0x4e   : > { %335 = vrot.lane.b32.xlu1 %v244_v1, %s976_s10  ;;  %316 = vrot.lane.b32.xlu0 %v308_v8, %s975_s9 }
  0x52   : > { %355 = vrot.lane.b32.xlu1 %v270_v2, %s977_s19  ;;  %337 = vrot.lane.b32.xlu0 %v854_v9, %s976_s10 }
  0x56   : > { %376 = vrot.lane.b32.xlu1 %v244_v1, %s978_s21  ;;  %357 = vrot.lane.b32.xlu0 %v349_v10, %s977_s19  ;;  %v409_v10 = vld [vmem:[%s1220_s1] sm:$0xff] }
  0x5a   : > { %312 = vrot.lane.b32.xlu1 %v244_v1, %s975_s9  ;;  %378 = vrot.lane.b32.xlu0 %v855_v11, %s978_s21  ;;  %s886_s9 = scalar_lea.vmem %s1172_s18, 384 }
  0x5b   : > { %p887_p8 = scmp.ne.s32.totalorder %s1172_s18, %s886_s9 }
  0x5d   : > { %p888_p11 = pnand %p887_p8, %p1230_p9 }
  0x5e   : > { %353 = vrot.lane.b32.xlu1 %v244_v1, %s977_s19  ;;  %333 = vrot.lane.b32.xlu0 %v248_v7, %s976_s10  ;;  %s983_s10 = smov [#allocation6]  }
  0x5f   : > { %p889_p0 = pneg %p888_p11  ;;  %s890_s19 = sshll.u32 %s983_s10, 4  ;;  %s891_s19 = int_to_ptr.vmem [resolvable:$false] %s890_s19 }
  0x60   : > { %p893_p5 = scmp.lt.s32.totalorder %s1172_s18, %s891_s19 }
  0x62   : > { %396 = vrot.lane.b32.xlu1 %v270_v2, %s980_s22  ;;  %374 = vrot.lane.b32.xlu0 %v248_v7, %s978_s21  ;;  %s892_s21 = scalar_lea.vmem %s891_s19, 768 }
  0x63   : > { %p894_p13 = scmp.lt.s32.totalorder %s892_s21, %s886_s9 }
  0x65   : > { %p895_p2 = por %p894_p13, %p893_p5 }
  0x66   : > { %394 = vrot.lane.b32.xlu1 %v244_v1, %s980_s22  ;;  %398 = vrot.lane.b32.xlu0 %v390_v13, %s980_s22 }
  0x67   : > { %p896_p4 = pnand %p895_p2, %p889_p0 }
  0x6a   : > { %428 = vperm.xlu0 %849, %v425_v15  }
  0xac   : > { %v276_v16 = vpop.permute.xlu1 %275  ;;  %v253_v17 = vpop.permute.xlu0 %252 }
  0xad   : > { %285 = vst.msk [vmem:[#allocation2 + $0x28] sm:$0xf] %vm242_vm0, %v276_v16 }
  0xb0   : > { %v274_v18 = vpop.permute.xlu1 %273  ;;  %v295_v19 = vpop.permute.xlu0 %294 }
  0xb1   : > { %v279_v20 = vsel %vm277_vm2, %v274_v18, %v276_v16 }
  0xb2   : > { %284 = vst [vmem:[#allocation2 + $0x20] sm:$0xf] %v279_v20 }
  0xb4   : > { %v297_v21 = vpop.permute.xlu1 %296  ;;  %v255_v22 = vpop.permute.xlu0 %254 }
  0xb5   : > { %v300_v23 = vsel %vm298_vm4, %v295_v19, %v297_v21  ;;  %306 = vst.msk [vmem:[#allocation2 + $0x28] sm:$0xf0] %vm264_vm3, %v297_v21  ;;  %v258_v24 = vsel %vm256_vm5, %v253_v17, %v255_v22  ;;  %265 = vst.msk [vmem:[#allocation2 + $0x10] sm:$0xf0] %vm264_vm3, %v255_v22 }
  0xb6   : > { %305 = vst [vmem:[#allocation2 + $0x20] sm:$0xf0] %v300_v23  ;;  %263 = vst [vmem:[#allocation2 + $0x8] sm:$0xf0] %v258_v24 }
  0xb8   : > { %v272_v25 = vpop.permute.xlu1 %271  ;;  %v251_v26 = vpop.permute.xlu0 %250 }
  0xb9   : > { %v278_v27 = vsel %vm277_vm2, %v272_v25, %v274_v18  ;;  %v257_v28 = vsel %vm256_vm5, %v251_v26, %v253_v17 }
  0xba   : > { %283 = vst [vmem:[#allocation2 + $0x18] sm:$0xf] %v278_v27  ;;  %262 = vst [vmem:[#allocation2] sm:$0xf0] %v257_v28 }
  0xbc   : > { %v315_v29 = vpop.permute.xlu1 %314  ;;  %v293_v30 = vpop.permute.xlu0 %292  ;;  %v412_v31 = vld [vmem:[#allocation2 + $0x10] sm:$0xff]  ;;  %v415_v32 = vld [vmem:[#allocation2 + $0x28] sm:$0xff] }
  0xbd   : > { %v299_v33 = vsel %vm298_vm4, %v293_v30, %v295_v19  ;;  %v765_v34 = vpack.c.bf16 %v415_v32, %v412_v31  ;;  %v411_v35 = vld [vmem:[#allocation2 + $0x8] sm:$0xff]  ;;  %v414_v36 = vld [vmem:[#allocation2 + $0x20] sm:$0xff] }
  0xbe   : > { %304 = vst [vmem:[#allocation2 + $0x18] sm:$0xf0] %v299_v33  ;;  %v756_v37 = vpack.c.bf16 %v414_v36, %v411_v35 }
  0xbf   : > { %766 = vmatpush3.bf16.msra.mxu1 %v765_v34 }
  0xc0   : > { %v336_v38 = vpop.permute.xlu1 %335  ;;  %v317_v39 = vpop.permute.xlu0 %316  ;;  %757 = vmatprep.subr.bf16.mxu0 %v756_v37  ;;  %767 = vmatprep.subr.bf16.mxu1 %v974_v6 }
  0xc1   : > { %v320_v40 = vsel %vm318_vm6, %v315_v29, %v317_v39  ;;  %326 = vst.msk [vmem:[#allocation2 + $0x40] sm:$0xf] %vm242_vm0, %v317_v39  ;;  %v410_v44 = vld [vmem:[#allocation2] sm:$0xff] }
  0xc2   : > { %325 = vst [vmem:[#allocation2 + $0x38] sm:$0xf] %v320_v40 }
  0xc4   : > { %v356_v41 = vpop.permute.xlu1 %355  ;;  %v338_v42 = vpop.permute.xlu0 %337 }
  0xc5   : > { %v341_v43 = vsel %vm339_vm7, %v336_v38, %v338_v42  ;;  %347 = vst.msk [vmem:[#allocation2 + $0x40] sm:$0xf0] %vm264_vm3, %v338_v42  ;;  %v413_v45 = vld [vmem:[#allocation2 + $0x18] sm:$0xff] }
  0xc6   : > { %346 = vst [vmem:[#allocation2 + $0x38] sm:$0xf0] %v341_v43  ;;  %v758_v46 = vpack.c.bf16 %v413_v45, %v410_v44 }
  0xc8   : > { %v377_v47 = vpop.permute.xlu1 %376  ;;  %v358_v48 = vpop.permute.xlu0 %357  ;;  %759 = vmatpush1.bf16.msra.mxu0 %v758_v46 }
  0xc9   : > { %v361_v49 = vsel %vm359_vm8, %v356_v41, %v358_v48  ;;  %367 = vst.msk [vmem:[#allocation2 + $0x58] sm:$0xf] %vm242_vm0, %v358_v48 }
  0xca   : > { %366 = vst [vmem:[#allocation2 + $0x50] sm:$0xf] %v361_v49 }
  0xcc   : > { %v313_v50 = vpop.permute.xlu1 %312  ;;  %v379_v51 = vpop.permute.xlu0 %378  ;;  %v418_v60 = vld [vmem:[#allocation2 + $0x40] sm:$0xff] }
  0xcd   : > { %v319_v52 = vsel %vm318_vm6, %v313_v50, %v315_v29  ;;  %v382_v53 = vsel %vm380_vm9, %v377_v47, %v379_v51  ;;  %388 = vst.msk [vmem:[#allocation2 + $0x58] sm:$0xf0] %vm264_vm3, %v379_v51  ;;  %v417_v0 = vld [vmem:[#allocation2 + $0x38] sm:$0xff] }
  0xce   : > { %324 = vst [vmem:[#allocation2 + $0x30] sm:$0xf] %v319_v52  ;;  %387 = vst [vmem:[#allocation2 + $0x50] sm:$0xf0] %v382_v53 }
  0xd0   : > { %v354_v54 = vpop.permute.xlu1 %353  ;;  %v334_v55 = vpop.permute.xlu0 %333 }
  0xd1   : > { %v360_v56 = vsel %vm359_vm8, %v354_v54, %v356_v41  ;;  %v340_v57 = vsel %vm339_vm7, %v334_v55, %v336_v38 }
  0xd2   : > { %365 = vst [vmem:[#allocation2 + $0x48] sm:$0xf] %v360_v56  ;;  %345 = vst [vmem:[#allocation2 + $0x30] sm:$0xf0] %v340_v57 }
  0xd4   : > { %v397_v58 = vpop.permute.xlu1 %396  ;;  %v375_v59 = vpop.permute.xlu0 %374  ;;  %v421_v61 = vld [vmem:[#allocation2 + $0x58] sm:$0xff] }
  0xd5   : > { %v381_v62 = vsel %vm380_vm9, %v375_v59, %v377_v47  ;;  %v768_v63 = vpack.c.bf16 %v421_v61, %v418_v60  ;;  %v420_v1 = vld [vmem:[#allocation2 + $0x50] sm:$0xff] }
  0xd6   : > { %386 = vst [vmem:[#allocation2 + $0x48] sm:$0xf0] %v381_v62  ;;  %v760_v2 = vpack.c.bf16 %v420_v1, %v417_v0 }
  0xd7   : > { %769 = vmatpush3.bf16.msra.mxu1 %v768_v63 }
  0xd8   : > { %v395_v3 = vpop.permute.xlu1 %394  ;;  %v399_v4 = vpop.permute.xlu0 %398  ;;  %761 = vmatprep.subr.bf16.mxu0 %v760_v2  ;;  %751 = vmatprep.subr.mxu1 %v979_v12 }
  0xd9   : > { %v401_v5 = vsel %vm400_vm10, %v395_v3, %v397_v58  ;;  %v402_v6 = vsel %vm400_vm10, %v397_v58, %v399_v4  ;;  %408 = vst.msk [vmem:[#allocation2 + $0x70] sm:$0xf] %vm242_vm0, %v399_v4  ;;  %v416_v7 = vld [vmem:[#allocation2 + $0x30] sm:$0xff] }
  0xda   : > { %406 = vst [vmem:[#allocation2 + $0x60] sm:$0xf] %v401_v5  ;;  %407 = vst [vmem:[#allocation2 + $0x68] sm:$0xf] %v402_v6 }
  0xdd   : > { %v419_v8 = vld [vmem:[#allocation2 + $0x48] sm:$0xff] }
  0xde   : > { %v762_v9 = vpack.c.bf16 %v419_v8, %v416_v7 }
  0xe0   : > { %763 = vmatpush1.bf16.msra.mxu0 %v762_v9  ;;  %v424_v11 = vld [vmem:[#allocation2 + $0x70] sm:$0xf] }
  0xe1   : > { %v423_v12 = vld [vmem:[#allocation2 + $0x68] sm:$0xf]  ;;  %752 = vmatpush3.msk.msra.mxu1 %vm435_vm11, %v424_v11  ;;  %v422_v13 = vld [vmem:[#allocation2 + $0x60] sm:$0xf] }
  0xe2   : > { %729 = vmatprep.subr.msk.mxu0 %vm435_vm11, %v423_v12  ;;  %754 = vmatmul.mubr.msk.f32.vlgmr.msra.gmra.mrb[0].mxu1 %vm431_vm12, %v409_v10 }
  0xe4   : > { %730 = vmatpush1.msk.msra.mxu0 %vm435_vm11, %v422_v13 }
  0xe5   : > { %731 = vmatmul.mubr.msk.f32.vlgmr.msra.gmra.mrb[0].mxu0 %vm431_vm12, %v409_v10 }
  0xe9   : > { %v429_v14 = vpop.permute.xlu0 %428 }
 0x1b5   : > { %v582_v15 = vpop.f32.mrb[0].mxu1 }
 0x1b6   : > { %v583_v16 = vadd.f32 %v582_v15, %v429_v14  ;;  %v755_v17 = vpop.f32.mrb[1].mxu1 }
 0x1b8   : > { %v511_v18 = vpop.f32.mrb[0].mxu0  ;;  %v588_v19 = vmax.f32 %v583_v16, 0.0 }
 0x1b9   : > { %v512_v20 = vadd.f32 %v511_v18, %v429_v14  ;;  %v513_v21 = vpop.f32.mrb[1].mxu0 }
 0x1ba   : > { %592 = vst.msk [vmem:[%s226_s11 + $0x10] sm:$0xff] %vm591_vm13, %v588_v19  ;;  %v514_v22 = vadd.f32 %v513_v21, %v429_v14 }
 0x1bb   : > { %v586_v23 = vmax.f32 %v512_v20, 0.0 }
 0x1bc   : > { %v587_v24 = vmax.f32 %v514_v22, 0.0 }
 0x1bd   : > { %589 = vst [vmem:[%s226_s11] sm:$0xff] %v586_v23 }
 0x1be   : > { %590 = vst [vmem:[%s226_s11 + $0x8] sm:$0xff] %v587_v24 }
 0x1bf   : > { %899 = shalt.err (!%p896_p4)
}
 0x1c0   : > { %s900_s6 = scalar_lea.hbm %s1170_s24, 384  ;;  %s904_s28 = scalar_lea.hbm %s1222_s3, 768 }
 0x1c1   : > { %p901_p6 = scmp.ne.s32.totalorder %s1170_s24, %s900_s6  ;;  %p905_p12 = scmp.lt.u32.totalorder %s1170_s24, %s1222_s3 }
 0x1c2   : > { %p906_p1 = scmp.lt.u32.totalorder %s904_s28, %s900_s6  ;;  %p908_p8 = scmp.lt.u32.totalorder %s900_s6, %s1170_s24 }
 0x1c3   : > { %p902_p7 = pnand %p901_p6, %p1230_p9 }
 0x1c4   : > { %p907_p3 = por %p906_p1, %p905_p12 }
 0x1c5   : > { %p903_p10 = pneg %p902_p7 }
 0x1c6   : > { %p909_p11 = por %p908_p8, %p907_p3 }
 0x1c8   : > { %p910_p0 = pnand %p909_p11, %p903_p10 }
 0x1ca   : > { %913 = shalt.err (!%p910_p0)
}
 0x1cb   : > { %777 = dma.vmem_to_hbm [thread:$0]  (%p1230_p9), %s1172_s18, 384, %s1170_s24, %s594_s15  }
 0x1cc PF: > { %s622_s5 = sand.u32 1, %s948_s12   ;;  %p1231_p5 = scmp.ne.s32.totalorder %s1227_s27, 0 }
 0x1cd   : > { %p1232_p13 = scmp.ge.s32.totalorder %s968_s17, 2  ;;  %s623_s8 = scalar_lea.sflag [#allocation5], %s622_s5 }
 0x1cf   : > { %p784_p2 = pnand %p1232_p13, %p1231_p5 }
 0x1d1   : > { %943 = dma.done.wait (!%p784_p2), %s623_s8, 384  }
 0x1d2   : > { %945 = vsyncadd (!%p784_p2), %s623_s8, 4294966912  ;;  %s19_s17 = sadd.s32 1, %s968_s17   ;;  %s1233_s12 = smov %s952_s13 }
 0x1d3   : > { %p16_p4 = scmp.ge.s32.totalorder %s19_s17, 4   ;;  %s1234_s13 = smov %s956_s14 }
 0x1d4   : > { %s1235_s14 = smov %s1060_s26  ;;  %s1236_s15 = smov %s964_s16 }
 0x1d5   : > { %s1237_s16 = smov %s1239_s20  ;;  %18 = sbr.rel (!%p16_p4) target bundleno = 6 (0x6), region = 83 }
 0x1dc   :  { %628 = vsyncpa [#allocation4], 1 }
 0x1dd   :  { %630 = vsyncpa [#allocation4 + $0x1], 1 }
 0x1de   :  { %631 = vsyncpa [#allocation5], 1 }
 0x1df   :  { %633 = vsyncpa [#allocation5 + $0x1], 1 }

</bundles_post_ra>
